<compile_context>
chip_gen: v5e
topology: v5e:2x2
jax: 0.10.0
libtpu: 0.0.40
codegen_flags: <defaults>
</compile_context>

<pallas_src>
import jax
import jax.numpy as jnp
from jax.experimental import pallas as pl
from jax.experimental.pallas import tpu as pltpu

HIGHEST = jax.lax.Precision.HIGHEST


def _edge_res_unit_kernel(H, W, Cin, Cg, Cmid, Cout, stride, use_se, residual):
    """Fused per-batch-element kernel: conv3x3+BN+ReLU -> (SE) -> conv1x1(stride)+BN -> (+id).

    Layouts (per batch element):
      x3_ref : (Cg, (H+2)*W) bf16   rows = kw*Cin + c (kw-shifted flattened padded input,
                                     zero-padded up to Cg = roundup(3*Cin, 16))
      w1_ref : (Cmid, 3*Cg)  bf16   columns = kh*Cg + kw*Cin + c  (BN folded)
      w2_ref : (Cout, Cmid)  bf16   (BN folded)
      o_ref  : (Cout, Hs*Ws) f32    lane-dense NCHW-flat output
    """
    HW = H * W
    Hs = (H - 1) // stride + 1
    Ws = (W - 1) // stride + 1

    def kernel(*refs):
        o_ref = refs[-1]
        it = iter(refs[:-1])
        x3_ref = next(it)            # (Cg, (H+2)*W) bf16
        w1_ref = next(it)            # (Cmid, 3*Cg)  bf16
        b1_ref = next(it)            # (Cmid, 1)     f32
        if use_se:
            wse1_ref = next(it)      # (Cmid, Cred)  f32
            bse1_ref = next(it)      # (1, Cred)     f32
            wse2_ref = next(it)      # (Cmid, Cred)  f32 (pre-transposed)
            bse2_ref = next(it)      # (Cmid, 1)     f32
        w2_ref = next(it)            # (Cout, Cmid)  bf16
        b2_ref = next(it)            # (Cout, 1)     f32
        if stride > 1:
            selw_ref = next(it)      # (W, Ws)       bf16 0/1 column selector

        x3 = x3_ref[...]                                             # (Cg, (H+2)*W) bf16

        # ---- im2col via 3 tile-aligned sublane concats of lane-shifted windows ----
        # slab kh contains taps (kh, kw=0..2, c=0..Cin-1) for every output pixel.
        xcol = jnp.concatenate(
            [x3[:, kh * W: kh * W + HW] for kh in range(3)], axis=0)  # (3*Cg, HW) bf16

        # ---- conv1 + folded BN + ReLU: a single MXU matmul, K = 3*Cg, f32 accumulation ----
        y = jnp.dot(w1_ref[...], xcol, preferred_element_type=jnp.float32)  # (Cmid, HW)
        y = jnp.maximum(y + b1_ref[...], 0.0)

        # ---- SE gate: squeeze -> FC -> ReLU -> FC -> sigmoid (tiny, exact f32 on VPU) ----
        if use_se:
            pooled = jnp.sum(y, axis=1, keepdims=True) * (1.0 / HW)          # (Cmid, 1)
            z = jnp.maximum(
                jnp.sum(wse1_ref[...] * pooled, axis=0, keepdims=True)
                + bse1_ref[...], 0.0)                                        # (1, Cred)
            gate = jax.nn.sigmoid(
                jnp.sum(wse2_ref[...] * z, axis=1, keepdims=True)
                + bse2_ref[...])                                             # (Cmid, 1)

        if stride == 1:
            # ---- conv2 (1x1) + folded BN (+ identity); one lane-dense store ----
            ys = (y * gate if use_se else y).astype(jnp.bfloat16)           # (Cmid, HW)
            out = jnp.dot(w2_ref[...], ys,
                          preferred_element_type=jnp.float32) + b2_ref[...]  # (Cout, HW)
            if residual:
                # identity = center tap (kh=1, kw=1) of the same activation buffer
                out = out + x3[Cin:2 * Cin, W:W + HW].astype(jnp.float32)
            o_ref[...] = out
        else:
            # ---- stride: per-output-row lane slice + tiny (W, Ws) 0/1 matmul,
            #      then 1x1 conv on just the kept pixels; row stores into the flat output ----
            selw = selw_ref[...]
            for ho in range(Hs):
                row = y[:, ho * stride * W: ho * stride * W + W]             # (Cmid, W)
                if use_se:
                    row = row * gate
                rsel = jnp.dot(row.astype(jnp.bfloat16), selw,
                               preferred_element_type=jnp.float32)           # (Cmid, Ws)
                out_row = jnp.dot(w2_ref[...], rsel.astype(jnp.bfloat16),
                                  preferred_element_type=jnp.float32) + b2_ref[...]
                o_ref[:, ho * Ws:(ho + 1) * Ws] = out_row                    # (Cout, Ws)

    return kernel


def effi_edge_res_unit(x_nchw, params, cfg):
    """Wrapper: NCHW in / NCHW out.  All hot-path compute inside the Pallas kernel."""
    N, Cin, H, W = x_nchw.shape
    Cout = cfg["out_channels"]
    Cmid = cfg["mid_channels"]
    stride = cfg["stride"]
    use_se = cfg["use_se"]
    residual = cfg["residual"]
    Hs = (H - 1) // stride + 1
    Ws = (W - 1) // stride + 1
    HW = H * W
    HWs = Hs * Ws
    Lp = (H + 2) * W
    Cg = ((3 * Cin + 15) // 16) * 16          # kw-group rows padded to the bf16 sublane tile

    # ---- activation prep (one XLA copy): zero-pad, build three W-shifted flattened copies,
    #      stack on the channel axis, zero-pad rows to Cg, cast to bf16 ----
    x = x_nchw.astype(jnp.float32)
    xpad = jnp.pad(x, ((0, 0), (0, 0), (1, 1), (1, 1)))               # (N, Cin, H+2, W+2)
    shifts = [xpad[:, :, :, kw:kw + W].reshape(N, Cin, Lp) for kw in range(3)]
    x3 = jnp.concatenate(shifts, axis=1)                              # (N, 3*Cin, Lp)
    if Cg > 3 * Cin:
        x3 = jnp.pad(x3, ((0, 0), (0, Cg - 3 * Cin), (0, 0)))
    x3 = x3.astype(jnp.bfloat16)

    # ---- weight preprocessing (trace-time, tiny) ----
    w1f = jnp.transpose(params["w1"], (3, 0, 1, 2)).reshape(Cmid, 3, 3 * Cin)
    if Cg > 3 * Cin:
        w1f = jnp.pad(w1f, ((0, 0), (0, 0), (0, Cg - 3 * Cin)))
    w1f = w1f.reshape(Cmid, 3 * Cg).astype(jnp.bfloat16)              # (Cmid, 3*Cg)
    b1c = params["b1"].reshape(Cmid, 1)
    w2t = jnp.transpose(params["w2"]).astype(jnp.bfloat16)            # (Cout, Cmid)
    b2c = params["b2"].reshape(Cout, 1)

    args = [x3, w1f, b1c]
    in_specs = [
        pl.BlockSpec((None, Cg, Lp), lambda n: (n, 0, 0)),
        pl.BlockSpec((Cmid, 3 * Cg), lambda n: (0, 0)),
        pl.BlockSpec((Cmid, 1), lambda n: (0, 0)),
    ]
    if use_se:
        Cred = params["wse1"].shape[1]
        wse2t = jnp.transpose(params["wse2"])                         # (Cmid, Cred)
        bse2c = params["bse2"].reshape(Cmid, 1)
        args += [params["wse1"], params["bse1"], wse2t, bse2c]
        in_specs += [
            pl.BlockSpec((Cmid, Cred), lambda n: (0, 0)),
            pl.BlockSpec((1, Cred), lambda n: (0, 0)),
            pl.BlockSpec((Cmid, Cred), lambda n: (0, 0)),
            pl.BlockSpec((Cmid, 1), lambda n: (0, 0)),
        ]
    args += [w2t, b2c]
    in_specs += [
        pl.BlockSpec((Cout, Cmid), lambda n: (0, 0)),
        pl.BlockSpec((Cout, 1), lambda n: (0, 0)),
    ]
    if stride > 1:
        selw = (jnp.arange(W)[:, None] ==
                jnp.arange(0, W, stride)[None, :]).astype(jnp.bfloat16)  # (W, Ws) 0/1
        args.append(selw)
        in_specs.append(pl.BlockSpec((W, Ws), lambda n: (0, 0)))

    # explicit scoped-VMEM budget (per-step working set, double-buffered I/O, headroom)
    per_step = (2 * Cg * Lp * 2                      # double-buffered bf16 activation input
                + 2 * Cout * HWs * 4                 # double-buffered f32 output
                + (Cmid * 3 * Cg + Cout * Cmid) * 2  # weights (bf16)
                + 3 * Cg * HW * 2                    # im2col value
                + 3 * Cmid * HW * 4                  # conv1 result + gated / bf16 copies
                + Cout * HWs * 4)
    vmem_limit = int(min(max(2 * per_step, 16 << 20), 48 << 20))

    kernel = _edge_res_unit_kernel(H, W, Cin, Cg, Cmid, Cout, stride, use_se, residual)

    out = pl.pallas_call(
        kernel,
        out_shape=jax.ShapeDtypeStruct((N, Cout, HWs), jnp.float32),
        grid_spec=pltpu.PrefetchScalarGridSpec(
            num_scalar_prefetch=0,
            grid=(N,),
            in_specs=in_specs,
            out_specs=pl.BlockSpec((None, Cout, HWs), lambda n: (n, 0, 0)),
        ),
        compiler_params=pltpu.CompilerParams(
            dimension_semantics=("parallel",),
            vmem_limit_bytes=vmem_limit,
        ),
    )(*args)

    return out.reshape(N, Cout, Hs, Ws)                               # already NCHW


# ----------------------------- parameter construction -----------------------------

def build_cfg(in_channels, out_channels, stride, exp_factor, se_factor,
              mid_from_in, use_skip):
    mid = in_channels * exp_factor if mid_from_in else out_channels * exp_factor
    cfg = {
        "in_channels": in_channels,
        "out_channels": out_channels,
        "stride": stride,
        "mid_channels": mid,
        "use_se": se_factor > 0,
        "residual": (in_channels == out_channels) and (stride == 1) and use_skip,
    }
    if se_factor > 0:
        cfg["red_channels"] = mid // (exp_factor * se_factor)
    return cfg


def make_params(key, cfg, bn_eps=1e-5):
    """Deterministic synthetic params; BN (eval mode) is folded into the conv weights."""
    Cin, Cout, Cmid = cfg["in_channels"], cfg["out_channels"], cfg["mid_channels"]
    ks = jax.random.split(key, 14)

    def bn_fold(kg, kb, km, kv, C):
        gamma = jax.random.uniform(kg, (C,), jnp.float32, 0.5, 1.5)
        beta = jax.random.normal(kb, (C,), jnp.float32) * 0.1
        mean = jax.random.normal(km, (C,), jnp.float32) * 0.1
        var = jax.random.uniform(kv, (C,), jnp.float32, 0.5, 1.5)
        scale = gamma / jnp.sqrt(var + bn_eps)
        return scale, beta - mean * scale

    # conv3x3 (HWIO) + BN fold
    w1 = jax.random.normal(ks[0], (3, 3, Cin, Cmid), jnp.float32) * 0.1
    s1, sh1 = bn_fold(ks[1], ks[2], ks[3], ks[4], Cmid)
    p = {"w1": w1 * s1, "b1": sh1.reshape(1, Cmid)}

    # conv1x1 (IO) + BN fold
    w2 = jax.random.normal(ks[5], (Cmid, Cout), jnp.float32) * 0.1
    s2, sh2 = bn_fold(ks[6], ks[7], ks[8], ks[9], Cout)
    p["w2"] = w2 * s2
    p["b2"] = sh2.reshape(1, Cout)

    if cfg["use_se"]:
        Cred = cfg["red_channels"]
        p["wse1"] = jax.random.normal(ks[10], (Cmid, Cred), jnp.float32) * 0.1
        p["bse1"] = (jax.random.normal(ks[11], (Cred,), jnp.float32) * 0.1).reshape(1, Cred)
        p["wse2"] = jax.random.normal(ks[12], (Cred, Cmid), jnp.float32) * 0.1
        p["bse2"] = (jax.random.normal(ks[13], (Cmid,), jnp.float32) * 0.1).reshape(1, Cmid)
    return p


# ----------------------------- pure-JAX reference ----------------------------------

def reference(x_nchw, params, cfg):
    """Reference matching the kernel's compute precision: conv/matmul operands rounded to
    bf16 (exact products, f32 accumulation); SE block exact f32; bias adds f32; the
    residual identity is the bf16-rounded activation (the kernel reads it from the bf16
    activation buffer)."""
    stride = cfg["stride"]

    def rb(a):  # round to bf16 and back (operand precision of the in-kernel matmuls)
        return a.astype(jnp.bfloat16).astype(jnp.float32)

    x = jnp.transpose(x_nchw, (0, 2, 3, 1)).astype(jnp.float32)
    y = jax.lax.conv_general_dilated(
        rb(x), rb(params["w1"]), (1, 1), [(1, 1), (1, 1)],
        dimension_numbers=("NHWC", "HWIO", "NHWC"), precision=HIGHEST)
    y = jnp.maximum(y + params["b1"].reshape(1, 1, 1, -1), 0.0)
    if cfg["use_se"]:
        pooled = jnp.mean(y, axis=(1, 2))
        z = jnp.maximum(jnp.dot(pooled, params["wse1"], precision=HIGHEST)
                        + params["bse1"], 0.0)
        gate = jax.nn.sigmoid(jnp.dot(z, params["wse2"], precision=HIGHEST)
                              + params["bse2"])
        y = y * gate[:, None, None, :]
    y = y[:, ::stride, ::stride, :]
    out = jnp.einsum("nhwc,co->nhwo", rb(y), rb(params["w2"]), precision=HIGHEST)
    out = out + params["b2"].reshape(1, 1, 1, -1)
    if cfg["residual"]:
        out = out + rb(x)
    return jnp.transpose(out, (0, 3, 1, 2))


# ----------------------------- main -------------------------------------------------

if __name__ == "__main__":
    # TODO(synk): only activation="relu" is implemented (EfficientNet-Edge default);
    # BatchNorm is folded (eval mode), training-mode batch statistics are not modelled.
    key = jax.random.PRNGKey(0)
    configs = [
        # (in, out, stride, exp_factor, se_factor, mid_from_in, use_skip)
        (4, 4, 1, 4, 0, True, True),    # residual, no SE (EfficientNet-Edge style)
        (4, 4, 1, 4, 2, True, True),    # residual + SE path
        (4, 8, 2, 2, 0, False, False),  # strided, channel-expanding, no skip
        (4, 8, 2, 2, 2, False, False),  # strided + SE (previously untested combination)
    ]
    for c in configs:
        cfg = build_cfg(*c)
        kx, kp, key = jax.random.split(key, 3)
        x = jax.random.normal(kx, (2, cfg["in_channels"], 16, 16), jnp.float32)
        params = make_params(kp, cfg)
        out = jax.block_until_ready(effi_edge_res_unit(x, params, cfg))
        ref = jax.block_until_ready(reference(x, params, cfg))
        assert out.shape == ref.shape, (out.shape, ref.shape)
        assert jnp.allclose(out, ref, atol=5e-3, rtol=5e-3), (
            "mismatch", float(jnp.max(jnp.abs(out - ref))))
    print("KERNEL_OK")
</pallas_src>

<mosaic_0001>
module attributes {stable_mosaic.version = 11 : i64} {
  func.func @kernel(%arg0: i32, %arg1: memref<1x16x288xbf16, #tpu.memory_space<vmem>>, %arg2: memref<16x48xbf16, #tpu.memory_space<vmem>>, %arg3: memref<16x1xf32, #tpu.memory_space<vmem>>, %arg4: memref<4x16xbf16, #tpu.memory_space<vmem>>, %arg5: memref<4x1xf32, #tpu.memory_space<vmem>>, %arg6: memref<1x4x256xf32, #tpu.memory_space<vmem>>) attributes {dimension_semantics = [#tpu.dimension_semantics<parallel>], iteration_bounds = array<i64: 2>, scalar_prefetch = 0 : i64, scratch_operands = 0 : i64, tpu.core_type = #tpu.core_type<tc>, window_params = [{transform_indices = @transform_0, window_bounds = array<i64: 1, 16, 288>}, {pipeline_mode = #tpu.pipeline_mode<synchronous>, transform_indices = @transform_1, window_bounds = array<i64: 16, 48>}, {pipeline_mode = #tpu.pipeline_mode<synchronous>, transform_indices = @transform_2, window_bounds = array<i64: 16, 1>}, {pipeline_mode = #tpu.pipeline_mode<synchronous>, transform_indices = @transform_3, window_bounds = array<i64: 4, 16>}, {pipeline_mode = #tpu.pipeline_mode<synchronous>, transform_indices = @transform_4, window_bounds = array<i64: 4, 1>}, {transform_indices = @transform_5, window_bounds = array<i64: 1, 4, 256>}]} {
    %c0 = arith.constant 0 : index
    %c0_0 = arith.constant 0 : index
    %c0_1 = arith.constant 0 : index
    %0 = vector.load %arg1[%c0, %c0_0, %c0_1] : memref<1x16x288xbf16, #tpu.memory_space<vmem>>, vector<1x16x288xbf16>
    %1 = vector.shape_cast %0 : vector<1x16x288xbf16> to vector<16x288xbf16>
    %2 = vector.extract_strided_slice %1 {offsets = [0, 0], sizes = [16, 256], strides = [1, 1]} : vector<16x288xbf16> to vector<16x256xbf16>
    %3 = vector.extract_strided_slice %1 {offsets = [0, 16], sizes = [16, 256], strides = [1, 1]} : vector<16x288xbf16> to vector<16x256xbf16>
    %4 = vector.extract_strided_slice %1 {offsets = [0, 32], sizes = [16, 256], strides = [1, 1]} : vector<16x288xbf16> to vector<16x256xbf16>
    %5 = tpu.concatenate %2, %3, %4 in 0 : vector<16x256xbf16>, vector<16x256xbf16>, vector<16x256xbf16> -> vector<48x256xbf16>
    %c0_2 = arith.constant 0 : index
    %c0_3 = arith.constant 0 : index
    %6 = vector.load %arg2[%c0_2, %c0_3] : memref<16x48xbf16, #tpu.memory_space<vmem>>, vector<16x48xbf16>
    %cst = arith.constant dense<0.000000e+00> : vector<16x256xf32>
    %7 = tpu.matmul %6, %5, %cst {dimension_numbers = #tpu.dot_dimension_numbers<[1], [0], [0], [1], [0, 0, 1, 1], [], []>} : vector<16x48xbf16>, vector<48x256xbf16>, vector<16x256xf32> -> vector<16x256xf32>
    %c0_4 = arith.constant 0 : index
    %c0_5 = arith.constant 0 : index
    %8 = vector.load %arg3[%c0_4, %c0_5] : memref<16x1xf32, #tpu.memory_space<vmem>>, vector<16x1xf32>
    %9 = vector.broadcast %8 : vector<16x1xf32> to vector<16x256xf32>
    %10 = arith.addf %7, %9 : vector<16x256xf32>
    %cst_6 = arith.constant 0.000000e+00 : f32
    %11 = vector.broadcast %cst_6 : f32 to vector<16x256xf32>
    %12 = arith.maximumf %10, %11 : vector<16x256xf32>
    %13 = arith.truncf %12 : vector<16x256xf32> to vector<16x256xbf16>
    %c0_7 = arith.constant 0 : index
    %c0_8 = arith.constant 0 : index
    %14 = vector.load %arg4[%c0_7, %c0_8] : memref<4x16xbf16, #tpu.memory_space<vmem>>, vector<4x16xbf16>
    %cst_9 = arith.constant dense<0.000000e+00> : vector<4x256xf32>
    %15 = tpu.matmul %14, %13, %cst_9 {dimension_numbers = #tpu.dot_dimension_numbers<[1], [0], [0], [1], [0, 0, 1, 1], [], []>} : vector<4x16xbf16>, vector<16x256xbf16>, vector<4x256xf32> -> vector<4x256xf32>
    %c0_10 = arith.constant 0 : index
    %c0_11 = arith.constant 0 : index
    %16 = vector.load %arg5[%c0_10, %c0_11] : memref<4x1xf32, #tpu.memory_space<vmem>>, vector<4x1xf32>
    %17 = vector.broadcast %16 : vector<4x1xf32> to vector<4x256xf32>
    %18 = arith.addf %15, %17 : vector<4x256xf32>
    %19 = vector.extract_strided_slice %1 {offsets = [4, 16], sizes = [4, 256], strides = [1, 1]} : vector<16x288xbf16> to vector<4x256xbf16>
    %20 = arith.extf %19 : vector<4x256xbf16> to vector<4x256xf32>
    %21 = arith.addf %18, %20 : vector<4x256xf32>
    %c0_12 = arith.constant 0 : index
    %c0_13 = arith.constant 0 : index
    %c0_14 = arith.constant 0 : index
    %22 = vector.load %arg6[%c0_12, %c0_13, %c0_14] : memref<1x4x256xf32, #tpu.memory_space<vmem>>, vector<1x4x256xf32>
    %23 = vector.shape_cast %22 : vector<1x4x256xf32> to vector<4x256xf32>
    %24 = vector.shape_cast %21 : vector<4x256xf32> to vector<1x4x256xf32>
    tpu.vector_store %arg6[%c0_12, %c0_13, %c0_14], %24 {strides = array<i32>} : memref<1x4x256xf32, #tpu.memory_space<vmem>>, vector<1x4x256xf32>,
    return
  }
  func.func @transform_0(%arg0: i32) -> (i32, i32, i32) {
    %c0_i32 = arith.constant 0 : i32
    %c0_i32_0 = arith.constant 0 : i32
    %c0_i32_1 = arith.constant 0 : i32
    return %arg0, %c0_i32, %c0_i32_0 : i32, i32, i32
  }
  func.func @transform_1(%arg0: i32) -> (i32, i32) {
    %c0_i32 = arith.constant 0 : i32
    %c0_i32_0 = arith.constant 0 : i32
    %c0_i32_1 = arith.constant 0 : i32
    return %c0_i32, %c0_i32_0 : i32, i32
  }
  func.func @transform_2(%arg0: i32) -> (i32, i32) {
    %c0_i32 = arith.constant 0 : i32
    %c0_i32_0 = arith.constant 0 : i32
    %c0_i32_1 = arith.constant 0 : i32
    return %c0_i32, %c0_i32_0 : i32, i32
  }
  func.func @transform_3(%arg0: i32) -> (i32, i32) {
    %c0_i32 = arith.constant 0 : i32
    %c0_i32_0 = arith.constant 0 : i32
    %c0_i32_1 = arith.constant 0 : i32
    return %c0_i32, %c0_i32_0 : i32, i32
  }
  func.func @transform_4(%arg0: i32) -> (i32, i32) {
    %c0_i32 = arith.constant 0 : i32
    %c0_i32_0 = arith.constant 0 : i32
    %c0_i32_1 = arith.constant 0 : i32
    return %c0_i32, %c0_i32_0 : i32, i32
  }
  func.func @transform_5(%arg0: i32) -> (i32, i32, i32) {
    %c0_i32 = arith.constant 0 : i32
    %c0_i32_0 = arith.constant 0 : i32
    %c0_i32_1 = arith.constant 0 : i32
    return %arg0, %c0_i32, %c0_i32_0 : i32, i32, i32
  }
}

</mosaic_0001>

<bundles_post_ra>
// kernel: tpu_custom_call.1
= control target key start
LH: loop header
LB: loop body
LE: loop exit
PB: predicated region body
PF: predicated region fallthrough
CT: control target
= control target key end

     0   :  { %10 = vsyncpa [#allocation3], 0  ;;  %s880_s0 = inlined_call_operand.hbm [shape: bf16[2,16,288], index: 0, kind: input, shape index: {}]   ;;  %s881_s1 = inlined_call_operand.vmem [shape: bf16[16,48], index: 1, kind: input, shape index: {}]   ;;  %s882_s2 = inlined_call_operand.vmem [shape: f32[16,1], index: 2, kind: input, shape index: {}]   ;;  %s883_s3 = inlined_call_operand.vmem [shape: bf16[4,16], index: 3, kind: input, shape index: {}]   ;;  %s884_s4 = inlined_call_operand.vmem [shape: f32[4,1], index: 4, kind: input, shape index: {}]   ;;  %s885_s5 = inlined_call_operand.hbm [shape: f32[2,4,256], index: 5, kind: output, shape index: {}]  }
   0x1   :  { %12 = vsyncpa [#allocation3 + $0x1], 0 }
   0x2   :  { %13 = vsyncpa [#allocation4], 0 }
   0x3   :  { %15 = vsyncpa [#allocation4 + $0x1], 0  ;;  %s728_s18 = smov 0   ;;  %s730_s19 = smov 0  }
   0x4   :  { %s732_s20 = smov 0   ;;  %s734_s21 = smov 0  }
   0x5 LB: > { %s749_s22 = sadd.s32 4294967295, %s691_s21   ;;  %s497_s23 = sadd.s32 4294967294, %s691_s21   ;;  %s691_s21 = sphi %s734_s21, %s893_s21   ;;  %s687_s20 = sphi %s732_s20, %s892_s20   ;;  %s683_s19 = sphi %s730_s19, %s891_s19   ;;  %s679_s18 = sphi %s728_s18, %s890_s18  }
   0x6   : > { %s753_s24 = sadd.s32 1, %s691_s21   ;;  %s28_s25 = sadd.s32 1, %s687_s20 }
   0x7   : > { %s25_s26 = ssub.s32 %s691_s21, %s753_s24  ;;  %p35_p0 = scmp.ne.s32.totalorder %s687_s20, %s683_s19 }
   0x8   : > { %p26_p1 = scmp.eq.s32.totalorder %s25_s26, 0  ;;  %p36_p2 = scmp.eq.s32.totalorder %s691_s21, 0 }
   0x9   : > { %p41_p3 = scmp.ne.s32.totalorder %s683_s19, %s679_s18  ;;  %p42_p4 = scmp.eq.s32.totalorder %s749_s22, 0 }
   0xa   : > { %s765_s27 = scalar_select %p26_p1, %s687_s20, %s28_s25  }
   0xb   : > { %p37_p5 = por %p36_p2, %p35_p0  ;;  %p767_p6 = por %p42_p4, %p41_p3 }
   0xc   : > { %p149_p7 = scmp.eq.s32.totalorder %s749_s22, 1  ;;  %p155_p8 = scmp.eq.s32.totalorder %s497_s23, 1 }
   0xd   : > { %p499_p9 = scmp.ge.s32.totalorder %s691_s21, 2  ;;  %p548_p10 = scmp.lt.s32.totalorder %s691_s21, 2 }
   0xe   : > { %p774_p11 = por %p149_p7, %p35_p0  ;;  %p778_p12 = por %p155_p8, %p41_p3 }
   0xf   : > { %s187_s6 = sand.u32 1, %s687_s20   ;;  %s534_s7 = smul.u32 24, %s691_s21 }
  0x10   : > { %s533_s8 = smul.u32 24, %s187_s6  ;;  %p787_p13 = pnand %p548_p10, %p37_p5 }
  0x11   : > { %s196_s11 = scalar_lea.hbm %s880_s0, %s534_s7  ;;  %s188_s16 = scalar_lea.sflag [#allocation3], %s187_s6 }
  0x12   : > { %s197_s13 = sshll.u32 %s196_s11, 4  ;;  %s191_s14 = scalar_lea.vmem [#allocation2], %s533_s8  ;;  %s198_s13 = int_to_ptr.hbm [resolvable:$true] %s197_s13 }
  0x13   : > { %s199_s15 = sshll.u32 %s191_s14, 4  ;;  %s595_s17 = sshra.s32 %s198_s13, 4  ;;  %s200_s15 = int_to_ptr.vmem [resolvable:$true] %s199_s15  ;;  %s596_s17 = int_to_ptr.hbm [resolvable:$true] %s595_s17 }
  0x14   : > { %s597_s23 = scalar_lea.hbm %s596_s17, 24  ;;  %p599_p1 = pneg %p787_p13 }
  0x15   : > { %p598_p0 = scmp.ne.s32.totalorder %s596_s17, %s597_s23  ;;  %s602_s7 = scalar_lea.hbm %s880_s0, 48 }
  0x16   : > { %p603_p4 = scmp.lt.s32.totalorder %s596_s17, %s880_s0  ;;  %p604_p5 = scmp.lt.s32.totalorder %s602_s7, %s597_s23 }
  0x17   : > { %p600_p2 = pnand %p599_p1, %p598_p0 }
  0x18   : > { %p605_p7 = por %p604_p5, %p603_p4 }
  0x19   : > { %p601_p3 = pneg %p600_p2 }
  0x1b   : > { %p606_p8 = pnand %p605_p7, %p601_p3 }
  0x1d   : > { %609 = shalt.err (!%p606_p8)
}
  0x1e   : > { %s693_s6 = smov 192   ;;  %s694_s8 = smov 12  }
  0x1f   : > { %543 = dma.hbm_to_vmem [thread:$0]  (!%p787_p13), %s198_s13, 384, %s200_s15, %s188_s16, %s693_s6, %s693_s6, %s694_s8  }
  0x20   : > { %p501_p10 = scmp.ge.s32.totalorder %s691_s21, 1  ;;  %p207_p0 = scmp.lt.s32.totalorder %s691_s21, 3 }
  0x22   : > { %p208_p1 = pnand %p501_p10, %p207_p0 }
  0x23   : > { %s804_s11 = sand.u32 (!%p208_p1), 1, %s683_s19  }
  0x24   : > { %211 = sbr.rel (%p208_p1) target bundleno = 466 (0x1d2), region = 40  ;;  %s214_s17 = scalar_lea.sflag (!%p208_p1), [#allocation3], %s804_s11 }
  0x25   : > { %s535_s14 = smul.u32 (!%p208_p1), 24, %s804_s11 }
  0x27   : > { %s808_s23 = scalar_lea.vmem (!%p208_p1), [#allocation2], %s535_s14 }
  0x29   : > { %670 = dma.done.wait (%p767_p6), %s214_s17, 384  }
  0x2a   : > { %672 = vsyncadd (%p767_p6), %s214_s17, 4294966912  ;;  %v505_v0 = vld [vmem:[%s808_s23] sm:$0xf]  ;;  %v529_v1 = vld [vmem:[%s808_s23 + $0x8] sm:$0xf0]  ;;  %s695_s12 = smov 96  }
  0x2b   : > { %v528_v2 = vld [vmem:[%s808_s23 + $0x4] sm:$0xf]  ;;  %v506_v3 = vor.u32 %v529_v1, %v505_v0  ;;  %v507_v4 = vld [vmem:[%s808_s23 + $0xc] sm:$0xf0]  ;;  %v513_v5 = vld [vmem:[%s808_s23 + $0x8] sm:$0xf] }
  0x2c   : > { %v530_v6 = vld [vmem:[%s808_s23 + $0x10] sm:$0xf0]  ;;  %v510_v7 = vor.u32 %v528_v2, %v507_v4  ;;  %s696_s28 = smov 112   ;;  %v289_v9 = vld [vmem:[%s882_s2] sm:$0xff]  ;;  %v697_v11 = vmov 0   ;;  %vm282_vm0 = vcmask 785408  }
  0x2d   : > { %v514_v8 = vor.u32 %v530_v6, %v513_v5  ;;  %276 = vrot.lane.b32.xlu1 %v506_v3, %s695_s12  ;;  %v290_v10 = vld [vmem:[%s882_s2 + $0x8] sm:$0xff]  ;;  %587 = vset.pattern.permute.xlu0 %v697_v11  ;;  %vm271_vm1 = vcmask 916480   ;;  %v531_v21 = vld [vmem:[%s881_s1] sm:$0xff]  ;;  %vm306_vm2 = vcmask 392192   ;;  %vm351_vm3 = vcmask 130048   ;;  %s502_s14 = sshll.u32 %s804_s11, 3 }
  0x2e   : > { %278 = vrot.lane.b32.xlu0 %v510_v7, %s695_s12  ;;  %588 = vset.pattern.permute.xlu1 %v697_v11  ;;  %v246_v23 = vld [vmem:[%s808_s23] sm:$0xff]  ;;  %v247_v24 = vld [vmem:[%s808_s23 + $0x8] sm:$0xf]  ;;  %s532_s17 = sshll.u32 %s749_s22, 3  ;;  %s244_s13 = scalar_lea.vmem [#allocation5], %s502_s14  ;;  %vm406_vm4 = vcmask 1043456  }
  0x2f   : > { %269 = vrot.lane.b32.xlu2 %v514_v8, %s696_s28  ;;  %v345_v25 = vld [vmem:[%s884_s4] sm:$0xf]  ;;  %v382_v26 = vunpack.c.h.bf16 %v246_v23  ;;  %v383_v27 = vunpack.c.l.bf16 %v247_v24  ;;  %v381_v28 = vunpack.c.l.bf16 %v246_v23  ;;  %s424_s15 = sshll.u32 %s244_s13, 4  ;;  %s411_s16 = scalar_lea.sflag [#allocation4], %s804_s11  ;;  %s425_s15 = int_to_ptr.vmem [resolvable:$true] %s424_s15 }
  0x30   : > { %589 = vset.pattern.permute.xlu2 %v697_v11  ;;  %v344_v46 = vld [vmem:[%s883_s3] sm:$0x3]  ;;  %s645_s10 = scalar_lea.hbm %s885_s5, 16 }
  0x31   : > { %v388_v29 = vrot.slane %v382_v26, 4  ;;  %v389_v30 = vrot.slane %v383_v27, 4  ;;  %v387_v32 = vrot.slane %v381_v28, 4 }
  0x33   : > { %v590_v31 = vpack.i.bf16 %v389_v30, %v388_v29 }
  0x35   : > { %267 = vrot.lane.b32.xlu1 %v510_v7, %s696_s28 }
  0x36   : > { %280 = vrot.lane.b32.xlu0 %v514_v8, %s695_s12 }
  0x37   : > { %265 = vrot.lane.b32.xlu2 %v506_v3, %s696_s28 }
  0x3d   : > { %298 = vperm.xlu1 %588, %v290_v10  }
  0x3e   : > { %293 = vperm.xlu0 %587, %v289_v9  }
  0x3f   : > { %348 = vperm.xlu2 %589, %v345_v25  }
  0x45   : > { %591 = vrot.lane.b32.xlu1 %v590_v31, %s696_s28 }
  0x47   : > { %390 = vrot.lane.b32.xlu2 %v387_v32, %s696_s28  ;;  %s422_s28 = scalar_lea.hbm %s885_s5, %s532_s17 }
  0x48   : > { %s426_s22 = sshll.u32 %s422_s28, 4  ;;  %s427_s22 = int_to_ptr.hbm [resolvable:$true] %s426_s22 }
  0x49   : > { %s639_s25 = sshra.s32 %s427_s22, 4  ;;  %s640_s25 = int_to_ptr.hbm [resolvable:$true] %s639_s25 }
  0x4a   : > { %s641_s26 = scalar_lea.hbm %s640_s25, 8  ;;  %p646_p3 = scmp.lt.s32.totalorder %s640_s25, %s885_s5 }
  0x4b   : > { %p642_p6 = scmp.ne.s32.totalorder %s640_s25, %s641_s26  ;;  %p647_p4 = scmp.lt.s32.totalorder %s645_s10, %s641_s26 }
  0x4d   : > { %p643_p13 = pnand %p642_p6, %p774_p11  ;;  %p648_p5 = por %p647_p4, %p646_p3 }
  0x4f   : > { %p644_p2 = pneg %p643_p13 }
  0x51   : > { %p649_p7 = pnand %p648_p5, %p644_p2 }
  0x89   : > { %v270_v12 = vpop.permute.xlu2 %269 }
  0x91   : > { %v266_v16 = vpop.permute.xlu2 %265 }
  0x99   : > { %v349_v50 = vpop.permute.xlu2 %348 }
  0x9f   : > { %v277_v13 = vpop.permute.xlu1 %276 }
  0xa0   : > { %v279_v14 = vpop.permute.xlu0 %278 }
  0xa1   : > { %v283_v15 = vsel %vm282_vm0, %v277_v13, %v279_v14  ;;  %v391_v55 = vpop.permute.xlu2 %390 }
  0xa2   : > { %315 = vmatpush.bf16.msra.mxu0 %v283_v15 }
  0xa7   : > { %v268_v17 = vpop.permute.xlu1 %267 }
  0xa8   : > { %v281_v18 = vpop.permute.xlu0 %280  ;;  %v272_v19 = vsel %vm271_vm1, %v266_v16, %v268_v17  ;;  %v273_v22 = vsel %vm271_vm1, %v268_v17, %v270_v12 }
  0xa9   : > { %316 = vmatpush.bf16.msra.mxu0 %v272_v19  ;;  %v284_v20 = vsel %vm282_vm0, %v279_v14, %v281_v18 }
  0xaa   : > { %329 = vmatpush.bf16.msra.mxu1 %v284_v20 }
  0xad   : > { %317 = vmatpush.bf16.msra.mxu0 %v506_v3 }
  0xae   : > { %330 = vmatpush.bf16.msra.mxu1 %v273_v22 }
  0xaf   : > { %v299_v36 = vpop.permute.xlu1 %298 }
  0xb0   : > { %519 = vmatmul.msk.bf16.vlgmr.msra.gmra.mxu0 %vm306_vm2, %v531_v21  ;;  %v294_v34 = vpop.permute.xlu0 %293 }
  0xb2   : > { %331 = vmatpush.bf16.msra.mxu1 %v510_v7 }
  0xb5   : > { %520 = vmatmul.msk.bf16.vlgmr.msra.gmra.mxu1 %vm306_vm2, %v531_v21 }
  0xb7   : > { %v592_v51 = vpop.permute.xlu1 %591 }
  0xb8   : > { %v594_v53 = vunpack.i.h.bf16 %v592_v51  ;;  %v593_v54 = vunpack.i.l.bf16 %v592_v51 }
  0xba   : > { %v398_v57 = vsel %vm271_vm1, %v593_v54, %v594_v53  ;;  %v397_v60 = vsel %vm271_vm1, %v391_v55, %v593_v54 }
 0x12d   : > { %v319_v33 = vpop.f32.mrf.mxu0 }
 0x12e   : > { %v320_v37 = vadd.f32 %v319_v33, %v294_v34 }
 0x130   : > { %v338_v40 = vmax.f32 %v320_v37, 0.0 }
 0x132   : > { %v333_v35 = vpop.f32.mrf.mxu1 }
 0x133   : > { %v334_v42 = vadd.f32 %v333_v35, %v294_v34 }
 0x135   : > { %v321_v38 = vpop.f32.mrf.mxu0  ;;  %v339_v47 = vmax.f32 %v334_v42, 0.0 }
 0x136   : > { %v322_v39 = vadd.f32 %v321_v38, %v299_v36 }
 0x138   : > { %v340_v41 = vmax.f32 %v322_v39, 0.0 }
 0x13a   : > { %v335_v43 = vpop.f32.mrf.mxu1  ;;  %v342_v44 = vpack.c.bf16 %v340_v41, %v338_v40 }
 0x13b   : > { %v336_v45 = vadd.f32 %v335_v43, %v299_v36 }
 0x13c   : > { %362 = vmatpush.bf16.msra.mxu2 %v342_v44 }
 0x13d   : > { %v341_v48 = vmax.f32 %v336_v45, 0.0 }
 0x13f   : > { %521 = vmatmul.msk.bf16.vlgmr.msra.gmra.mxu2 %vm351_vm3, %v344_v46  ;;  %v343_v49 = vpack.c.bf16 %v341_v48, %v339_v47 }
 0x141   : > { %375 = vmatpush.bf16.msra.mxu3 %v343_v49 }
 0x144   : > { %522 = vmatmul.msk.bf16.vlgmr.msra.gmra.mxu3 %vm351_vm3, %v344_v46 }
 0x1c2   : > { %v364_v52 = vpop.f32.mrf.mxu2 }
 0x1c3   : > { %v365_v58 = vadd.f32 %v364_v52, %v349_v50 }
 0x1c5   : > { %v401_v63 = vadd.f32 %v397_v60, %v365_v58 }
 0x1c7   : > { %v377_v56 = vpop.f32.mrf.mxu3 }
 0x1c8   : > { %v378_v59 = vadd.f32 %v377_v56, %v349_v50 }
 0x1ca   : > { %v402_v61 = vadd.f32 %v398_v57, %v378_v59  ;;  %v366_v62 = vpop.f32.mrf.mxu2 }
 0x1cc   : > { %v405_v0 = vrot.slane %v402_v61, 4 }
 0x1ce   : > { %v407_v1 = vsel %vm406_vm4, %v401_v63, %v405_v0 }
 0x1cf   : > { %v379_v2 = vpop.f32.mrf.mxu3  ;;  %409 = vst [vmem:[%s244_s13] sm:$0xff] %v407_v1 }
 0x1d0   : > { %652 = shalt.err (!%p649_p7)
}
 0x1d1   : > { %538 = dma.vmem_to_hbm [thread:$0]  (%p774_p11), %s425_s15, 128, %s427_s22, %s411_s16  }
 0x1d2 PF: > { %s438_s11 = sand.u32 1, %s679_s18   ;;  %p545_p8 = pnand %p499_p9, %p778_p12 }
 0x1d3   : > { %s439_s14 = scalar_lea.sflag [#allocation4], %s438_s11 }
 0x1d4   : > { %p546_p10 = pneg %p545_p8 }
 0x1d6   : > { %674 = dma.done.wait (%p546_p10), %s439_s14, 128  }
 0x1d7   : > { %676 = vsyncadd (%p546_p10), %s439_s14, 4294967168  ;;  %p18_p0 = scmp.ge.s32.totalorder %s753_s24, 4   ;;  %s890_s18 = smov %s683_s19 }
 0x1d8   : > { %s891_s19 = smov %s687_s20  ;;  %s892_s20 = smov %s765_s27 }
 0x1d9   : > { %s893_s21 = smov %s753_s24  ;;  %20 = sbr.rel (!%p18_p0) target bundleno = 5 (0x5), region = 85 }
 0x1de   :  { %445 = vsyncpa [#allocation3], 1 }
 0x1df   :  { %447 = vsyncpa [#allocation3 + $0x1], 1 }
 0x1e0   :  { %448 = vsyncpa [#allocation4], 1 }
 0x1e1   :  { %450 = vsyncpa [#allocation4 + $0x1], 1 }

</bundles_post_ra>
